<compile_context>
chip_gen: v6e
topology: v6e:2x2x1
jax: 0.10.0
libtpu: 0.0.40
codegen_flags: <defaults>
</compile_context>

<pallas_src>
import functools

import jax
import jax.numpy as jnp
from jax import lax
from jax.experimental import pallas as pl
from jax.experimental.pallas import tpu as pltpu

_LANES = 128  # lane-dense output row width (multiple of 128 -> unmasked main store)


def _hnull_kernel(theta_smem, theta_row_ref, out_ref, *, d, head_len):
    # theta_smem    : SMEM (W,)        float32   full theta (scalar reads)
    # theta_row_ref : VMEM (1, W)      float32   same theta as a lane row
    # out_ref       : VMEM (1, _LANES) float32
    #   out[0, :head_len]                     = theta[:head_len]
    #   out[0, head_len + k*d + c]            = argsort(theta[-d:])[k] * c
    #   out[0, head_len + d*d:]               = 0 (sliced away by the wrapper)
    lanes = out_ref.shape[1]

    # ---- scalar-unit stable argsort ranks (28 pairwise comparisons for d=8) ----
    vp = [theta_smem[head_len + j] for j in range(d)]
    rank = [jnp.int32(0) for _ in range(d)]
    for i in range(d):
        for j in range(i + 1, d):
            # stable ascending order: on ties the smaller original index wins
            i_first = (vp[i] <= vp[j]).astype(jnp.int32)
            rank[j] = rank[j] + i_first
            rank[i] = rank[i] + (1 - i_first)
    # rank[j] = sorted position of element j  =>  argsort[rank[j]] = j

    # ---- build the lane-dense output row (pure VPU, no XLU) ----
    lane = lax.broadcasted_iota(jnp.int32, (1, lanes), 1)
    rel = jnp.maximum(lane - head_len, 0)          # 0 for head lanes (harmless)
    if d & (d - 1) == 0:                           # power-of-two fast path (d=8)
        shift = d.bit_length() - 1
        k_idx = rel >> shift                       # sorted position per lane group
        c_idx = rel & (d - 1)                      # column within the outer product
    else:
        k_idx = rel // d
        c_idx = rel % d

    # jsel[lane] = argsort[k_idx(lane)]  (0 outside the matrix region)
    jsel = jnp.zeros((1, lanes), jnp.int32)
    for j in range(d):
        jsel = jnp.where(k_idx == rank[j], jnp.int32(j), jsel)

    # outer(argsort, arange(d)) flattened; head / pad lanes evaluate to 0 here.
    out_ref[...] = jsel.astype(jnp.float32) * c_idx.astype(jnp.float32)

    # Overwrite the head lanes with theta[:head_len] (single small masked store).
    if head_len > 0:
        out_ref[:, :head_len] = theta_row_ref[:, :head_len]


def hnull_vector_p_forward(theta, d):
    """Pallas implementation of hNullVectorP.forward (the module input x is ignored)."""
    W = theta.shape[0]
    head_len = W - d
    out_len = head_len + d * d
    assert out_len <= _LANES, "this kernel is specialized for small d (output fits one lane row)"

    theta = theta.astype(jnp.float32)
    theta_row = theta.reshape(1, W)  # free reshape; gives the kernel a lane view of theta

    kernel = functools.partial(_hnull_kernel, d=d, head_len=head_len)

    row = pl.pallas_call(
        kernel,
        out_shape=jax.ShapeDtypeStruct((1, _LANES), jnp.float32),
        in_specs=[
            pl.BlockSpec(memory_space=pltpu.MemorySpace.SMEM),   # theta scalars
            pl.BlockSpec(memory_space=pltpu.MemorySpace.VMEM),   # theta lane row
        ],
        out_specs=pl.BlockSpec(memory_space=pltpu.MemorySpace.VMEM),
        cost_estimate=pl.CostEstimate(flops=512, transcendentals=0, bytes_accessed=1024),
    )(theta, theta_row)

    # Single static slice; fuses into the consumer.
    return row[0, :out_len]


def _reference_forward(theta, d):
    head = theta[:-d]
    vp = theta[-d:]
    argsorted = jnp.argsort(vp)
    matrix = jnp.outer(argsorted, jnp.arange(d)).astype(jnp.float32)
    return jnp.concatenate([head.astype(jnp.float32), matrix.reshape(-1)])


if __name__ == "__main__":
    d = 8
    batch_size = 32          # fixed to 32 in hNullVectorP.__init__
    bound = 1.0
    theta_width = d * (d - 1) // 2 + d   # 36 for d=8

    key = jax.random.PRNGKey(0)
    k_theta, k_x = jax.random.split(key)

    # deterministic parameter init: uniform(-bound, bound), like reset_parameters()
    theta = jax.random.uniform(
        k_theta, (theta_width,), minval=-bound, maxval=bound, dtype=jnp.float32)

    # x is accepted but ignored by hNullVectorP.forward; kept for shape convention.
    x = jax.random.normal(k_x, (batch_size, d), dtype=jnp.float32)  # unused

    out = hnull_vector_p_forward(theta, d)
    out = jax.block_until_ready(out)

    ref = _reference_forward(theta, d)
    assert out.shape == (theta_width - d + d * d,)
    assert jnp.allclose(out, ref), "mismatch vs pure-JAX reference"

    print("KERNEL_OK")
</pallas_src>

<mosaic_0001>
module attributes {stable_mosaic.version = 11 : i64} {
  func.func @_hnull_kernel(%arg0: memref<36xf32, #tpu.memory_space<smem>>, %arg1: memref<1x36xf32, #tpu.memory_space<vmem>>, %arg2: memref<1x128xf32, #tpu.memory_space<vmem>>) attributes {dimension_semantics = [], scalar_prefetch = 0 : i64, scratch_operands = 0 : i64, tpu.core_type = #tpu.core_type<tc>} {
    %c28 = arith.constant 28 : index
    %0 = memref.load %arg0[%c28] : memref<36xf32, #tpu.memory_space<smem>>
    %c29 = arith.constant 29 : index
    %1 = memref.load %arg0[%c29] : memref<36xf32, #tpu.memory_space<smem>>
    %c30 = arith.constant 30 : index
    %2 = memref.load %arg0[%c30] : memref<36xf32, #tpu.memory_space<smem>>
    %c31 = arith.constant 31 : index
    %3 = memref.load %arg0[%c31] : memref<36xf32, #tpu.memory_space<smem>>
    %c32 = arith.constant 32 : index
    %4 = memref.load %arg0[%c32] : memref<36xf32, #tpu.memory_space<smem>>
    %c33 = arith.constant 33 : index
    %5 = memref.load %arg0[%c33] : memref<36xf32, #tpu.memory_space<smem>>
    %c34 = arith.constant 34 : index
    %6 = memref.load %arg0[%c34] : memref<36xf32, #tpu.memory_space<smem>>
    %c35 = arith.constant 35 : index
    %7 = memref.load %arg0[%c35] : memref<36xf32, #tpu.memory_space<smem>>
    %8 = arith.cmpf ole, %0, %1 : f32
    %9 = arith.extui %8 : i1 to i32
    %c0_i32 = arith.constant 0 : i32
    %10 = arith.addi %c0_i32, %9 : i32
    %c1_i32 = arith.constant 1 : i32
    %11 = arith.subi %c1_i32, %9 : i32
    %c0_i32_0 = arith.constant 0 : i32
    %12 = arith.addi %c0_i32_0, %11 : i32
    %13 = arith.cmpf ole, %0, %2 : f32
    %14 = arith.extui %13 : i1 to i32
    %c0_i32_1 = arith.constant 0 : i32
    %15 = arith.addi %c0_i32_1, %14 : i32
    %c1_i32_2 = arith.constant 1 : i32
    %16 = arith.subi %c1_i32_2, %14 : i32
    %17 = arith.addi %12, %16 : i32
    %18 = arith.cmpf ole, %0, %3 : f32
    %19 = arith.extui %18 : i1 to i32
    %c0_i32_3 = arith.constant 0 : i32
    %20 = arith.addi %c0_i32_3, %19 : i32
    %c1_i32_4 = arith.constant 1 : i32
    %21 = arith.subi %c1_i32_4, %19 : i32
    %22 = arith.addi %17, %21 : i32
    %23 = arith.cmpf ole, %0, %4 : f32
    %24 = arith.extui %23 : i1 to i32
    %c0_i32_5 = arith.constant 0 : i32
    %25 = arith.addi %c0_i32_5, %24 : i32
    %c1_i32_6 = arith.constant 1 : i32
    %26 = arith.subi %c1_i32_6, %24 : i32
    %27 = arith.addi %22, %26 : i32
    %28 = arith.cmpf ole, %0, %5 : f32
    %29 = arith.extui %28 : i1 to i32
    %c0_i32_7 = arith.constant 0 : i32
    %30 = arith.addi %c0_i32_7, %29 : i32
    %c1_i32_8 = arith.constant 1 : i32
    %31 = arith.subi %c1_i32_8, %29 : i32
    %32 = arith.addi %27, %31 : i32
    %33 = arith.cmpf ole, %0, %6 : f32
    %34 = arith.extui %33 : i1 to i32
    %c0_i32_9 = arith.constant 0 : i32
    %35 = arith.addi %c0_i32_9, %34 : i32
    %c1_i32_10 = arith.constant 1 : i32
    %36 = arith.subi %c1_i32_10, %34 : i32
    %37 = arith.addi %32, %36 : i32
    %38 = arith.cmpf ole, %0, %7 : f32
    %39 = arith.extui %38 : i1 to i32
    %c0_i32_11 = arith.constant 0 : i32
    %40 = arith.addi %c0_i32_11, %39 : i32
    %c1_i32_12 = arith.constant 1 : i32
    %41 = arith.subi %c1_i32_12, %39 : i32
    %42 = arith.addi %37, %41 : i32
    %43 = arith.cmpf ole, %1, %2 : f32
    %44 = arith.extui %43 : i1 to i32
    %45 = arith.addi %15, %44 : i32
    %c1_i32_13 = arith.constant 1 : i32
    %46 = arith.subi %c1_i32_13, %44 : i32
    %47 = arith.addi %10, %46 : i32
    %48 = arith.cmpf ole, %1, %3 : f32
    %49 = arith.extui %48 : i1 to i32
    %50 = arith.addi %20, %49 : i32
    %c1_i32_14 = arith.constant 1 : i32
    %51 = arith.subi %c1_i32_14, %49 : i32
    %52 = arith.addi %47, %51 : i32
    %53 = arith.cmpf ole, %1, %4 : f32
    %54 = arith.extui %53 : i1 to i32
    %55 = arith.addi %25, %54 : i32
    %c1_i32_15 = arith.constant 1 : i32
    %56 = arith.subi %c1_i32_15, %54 : i32
    %57 = arith.addi %52, %56 : i32
    %58 = arith.cmpf ole, %1, %5 : f32
    %59 = arith.extui %58 : i1 to i32
    %60 = arith.addi %30, %59 : i32
    %c1_i32_16 = arith.constant 1 : i32
    %61 = arith.subi %c1_i32_16, %59 : i32
    %62 = arith.addi %57, %61 : i32
    %63 = arith.cmpf ole, %1, %6 : f32
    %64 = arith.extui %63 : i1 to i32
    %65 = arith.addi %35, %64 : i32
    %c1_i32_17 = arith.constant 1 : i32
    %66 = arith.subi %c1_i32_17, %64 : i32
    %67 = arith.addi %62, %66 : i32
    %68 = arith.cmpf ole, %1, %7 : f32
    %69 = arith.extui %68 : i1 to i32
    %70 = arith.addi %40, %69 : i32
    %c1_i32_18 = arith.constant 1 : i32
    %71 = arith.subi %c1_i32_18, %69 : i32
    %72 = arith.addi %67, %71 : i32
    %73 = arith.cmpf ole, %2, %3 : f32
    %74 = arith.extui %73 : i1 to i32
    %75 = arith.addi %50, %74 : i32
    %c1_i32_19 = arith.constant 1 : i32
    %76 = arith.subi %c1_i32_19, %74 : i32
    %77 = arith.addi %45, %76 : i32
    %78 = arith.cmpf ole, %2, %4 : f32
    %79 = arith.extui %78 : i1 to i32
    %80 = arith.addi %55, %79 : i32
    %c1_i32_20 = arith.constant 1 : i32
    %81 = arith.subi %c1_i32_20, %79 : i32
    %82 = arith.addi %77, %81 : i32
    %83 = arith.cmpf ole, %2, %5 : f32
    %84 = arith.extui %83 : i1 to i32
    %85 = arith.addi %60, %84 : i32
    %c1_i32_21 = arith.constant 1 : i32
    %86 = arith.subi %c1_i32_21, %84 : i32
    %87 = arith.addi %82, %86 : i32
    %88 = arith.cmpf ole, %2, %6 : f32
    %89 = arith.extui %88 : i1 to i32
    %90 = arith.addi %65, %89 : i32
    %c1_i32_22 = arith.constant 1 : i32
    %91 = arith.subi %c1_i32_22, %89 : i32
    %92 = arith.addi %87, %91 : i32
    %93 = arith.cmpf ole, %2, %7 : f32
    %94 = arith.extui %93 : i1 to i32
    %95 = arith.addi %70, %94 : i32
    %c1_i32_23 = arith.constant 1 : i32
    %96 = arith.subi %c1_i32_23, %94 : i32
    %97 = arith.addi %92, %96 : i32
    %98 = arith.cmpf ole, %3, %4 : f32
    %99 = arith.extui %98 : i1 to i32
    %100 = arith.addi %80, %99 : i32
    %c1_i32_24 = arith.constant 1 : i32
    %101 = arith.subi %c1_i32_24, %99 : i32
    %102 = arith.addi %75, %101 : i32
    %103 = arith.cmpf ole, %3, %5 : f32
    %104 = arith.extui %103 : i1 to i32
    %105 = arith.addi %85, %104 : i32
    %c1_i32_25 = arith.constant 1 : i32
    %106 = arith.subi %c1_i32_25, %104 : i32
    %107 = arith.addi %102, %106 : i32
    %108 = arith.cmpf ole, %3, %6 : f32
    %109 = arith.extui %108 : i1 to i32
    %110 = arith.addi %90, %109 : i32
    %c1_i32_26 = arith.constant 1 : i32
    %111 = arith.subi %c1_i32_26, %109 : i32
    %112 = arith.addi %107, %111 : i32
    %113 = arith.cmpf ole, %3, %7 : f32
    %114 = arith.extui %113 : i1 to i32
    %115 = arith.addi %95, %114 : i32
    %c1_i32_27 = arith.constant 1 : i32
    %116 = arith.subi %c1_i32_27, %114 : i32
    %117 = arith.addi %112, %116 : i32
    %118 = arith.cmpf ole, %4, %5 : f32
    %119 = arith.extui %118 : i1 to i32
    %120 = arith.addi %105, %119 : i32
    %c1_i32_28 = arith.constant 1 : i32
    %121 = arith.subi %c1_i32_28, %119 : i32
    %122 = arith.addi %100, %121 : i32
    %123 = arith.cmpf ole, %4, %6 : f32
    %124 = arith.extui %123 : i1 to i32
    %125 = arith.addi %110, %124 : i32
    %c1_i32_29 = arith.constant 1 : i32
    %126 = arith.subi %c1_i32_29, %124 : i32
    %127 = arith.addi %122, %126 : i32
    %128 = arith.cmpf ole, %4, %7 : f32
    %129 = arith.extui %128 : i1 to i32
    %130 = arith.addi %115, %129 : i32
    %c1_i32_30 = arith.constant 1 : i32
    %131 = arith.subi %c1_i32_30, %129 : i32
    %132 = arith.addi %127, %131 : i32
    %133 = arith.cmpf ole, %5, %6 : f32
    %134 = arith.extui %133 : i1 to i32
    %135 = arith.addi %125, %134 : i32
    %c1_i32_31 = arith.constant 1 : i32
    %136 = arith.subi %c1_i32_31, %134 : i32
    %137 = arith.addi %120, %136 : i32
    %138 = arith.cmpf ole, %5, %7 : f32
    %139 = arith.extui %138 : i1 to i32
    %140 = arith.addi %130, %139 : i32
    %c1_i32_32 = arith.constant 1 : i32
    %141 = arith.subi %c1_i32_32, %139 : i32
    %142 = arith.addi %137, %141 : i32
    %143 = arith.cmpf ole, %6, %7 : f32
    %144 = arith.extui %143 : i1 to i32
    %145 = arith.addi %140, %144 : i32
    %c1_i32_33 = arith.constant 1 : i32
    %146 = arith.subi %c1_i32_33, %144 : i32
    %147 = arith.addi %135, %146 : i32
    %148 = tpu.iota {dimensions = array<i32: 1>} : vector<1x128xi32>
    %c28_i32 = arith.constant 28 : i32
    %149 = vector.broadcast %c28_i32 : i32 to vector<1x128xi32>
    %150 = arith.subi %148, %149 : vector<1x128xi32>
    %c0_i32_34 = arith.constant 0 : i32
    %151 = vector.broadcast %c0_i32_34 : i32 to vector<1x128xi32>
    %152 = arith.maxsi %150, %151 : vector<1x128xi32>
    %c3_i32 = arith.constant 3 : i32
    %153 = vector.broadcast %c3_i32 : i32 to vector<1x128xi32>
    %154 = arith.shrsi %152, %153 : vector<1x128xi32>
    %c7_i32 = arith.constant 7 : i32
    %155 = vector.broadcast %c7_i32 : i32 to vector<1x128xi32>
    %156 = arith.andi %152, %155 : vector<1x128xi32>
    %c0_i32_35 = arith.constant 0 : i32
    %157 = vector.broadcast %c0_i32_35 : i32 to vector<1x128xi32>
    %158 = vector.broadcast %42 : i32 to vector<1x128xi32>
    %159 = arith.cmpi eq, %154, %158 : vector<1x128xi32>
    %c0_i32_36 = arith.constant 0 : i32
    %160 = vector.broadcast %c0_i32_36 : i32 to vector<1x128xi32>
    %161 = arith.select %159, %160, %157 : vector<1x128xi1>, vector<1x128xi32>
    %162 = vector.broadcast %72 : i32 to vector<1x128xi32>
    %163 = arith.cmpi eq, %154, %162 : vector<1x128xi32>
    %c1_i32_37 = arith.constant 1 : i32
    %164 = vector.broadcast %c1_i32_37 : i32 to vector<1x128xi32>
    %165 = arith.select %163, %164, %161 : vector<1x128xi1>, vector<1x128xi32>
    %166 = vector.broadcast %97 : i32 to vector<1x128xi32>
    %167 = arith.cmpi eq, %154, %166 : vector<1x128xi32>
    %c2_i32 = arith.constant 2 : i32
    %168 = vector.broadcast %c2_i32 : i32 to vector<1x128xi32>
    %169 = arith.select %167, %168, %165 : vector<1x128xi1>, vector<1x128xi32>
    %170 = vector.broadcast %117 : i32 to vector<1x128xi32>
    %171 = arith.cmpi eq, %154, %170 : vector<1x128xi32>
    %c3_i32_38 = arith.constant 3 : i32
    %172 = vector.broadcast %c3_i32_38 : i32 to vector<1x128xi32>
    %173 = arith.select %171, %172, %169 : vector<1x128xi1>, vector<1x128xi32>
    %174 = vector.broadcast %132 : i32 to vector<1x128xi32>
    %175 = arith.cmpi eq, %154, %174 : vector<1x128xi32>
    %c4_i32 = arith.constant 4 : i32
    %176 = vector.broadcast %c4_i32 : i32 to vector<1x128xi32>
    %177 = arith.select %175, %176, %173 : vector<1x128xi1>, vector<1x128xi32>
    %178 = vector.broadcast %142 : i32 to vector<1x128xi32>
    %179 = arith.cmpi eq, %154, %178 : vector<1x128xi32>
    %c5_i32 = arith.constant 5 : i32
    %180 = vector.broadcast %c5_i32 : i32 to vector<1x128xi32>
    %181 = arith.select %179, %180, %177 : vector<1x128xi1>, vector<1x128xi32>
    %182 = vector.broadcast %147 : i32 to vector<1x128xi32>
    %183 = arith.cmpi eq, %154, %182 : vector<1x128xi32>
    %c6_i32 = arith.constant 6 : i32
    %184 = vector.broadcast %c6_i32 : i32 to vector<1x128xi32>
    %185 = arith.select %183, %184, %181 : vector<1x128xi1>, vector<1x128xi32>
    %186 = vector.broadcast %145 : i32 to vector<1x128xi32>
    %187 = arith.cmpi eq, %154, %186 : vector<1x128xi32>
    %c7_i32_39 = arith.constant 7 : i32
    %188 = vector.broadcast %c7_i32_39 : i32 to vector<1x128xi32>
    %189 = arith.select %187, %188, %185 : vector<1x128xi1>, vector<1x128xi32>
    %190 = arith.sitofp %189 : vector<1x128xi32> to vector<1x128xf32>
    %191 = arith.sitofp %156 : vector<1x128xi32> to vector<1x128xf32>
    %192 = arith.mulf %190, %191 : vector<1x128xf32>
    %c0 = arith.constant 0 : index
    %c0_40 = arith.constant 0 : index
    %193 = vector.load %arg2[%c0, %c0_40] : memref<1x128xf32, #tpu.memory_space<vmem>>, vector<1x128xf32>
    tpu.vector_store %arg2[%c0, %c0_40], %192 {strides = array<i32>} : memref<1x128xf32, #tpu.memory_space<vmem>>, vector<1x128xf32>,
    %c0_41 = arith.constant 0 : index
    %c0_42 = arith.constant 0 : index
    %194 = vector.load %arg1[%c0_41, %c0_42] : memref<1x36xf32, #tpu.memory_space<vmem>>, vector<1x28xf32>
    %c0_43 = arith.constant 0 : index
    %c0_44 = arith.constant 0 : index
    %195 = vector.load %arg2[%c0_43, %c0_44] : memref<1x128xf32, #tpu.memory_space<vmem>>, vector<1x28xf32>
    tpu.vector_store %arg2[%c0_43, %c0_44], %194 {strides = array<i32>} : memref<1x128xf32, #tpu.memory_space<vmem>>, vector<1x28xf32>,
    return
  }
}

</mosaic_0001>

<bundles_post_ra>
// kernel: tpu_custom_call.1
= control target key start
LH: loop header
LB: loop body
LE: loop exit
PB: predicated region body
PF: predicated region fallthrough
CT: control target
= control target key end

     0   :  { %7 = vsyncpa [#allocation4], 0  ;;  %s405_s0 = inlined_call_operand.hbm [shape: f32[36], index: 0, kind: input, shape index: {}]   ;;  %s406_s1 = inlined_call_operand.vmem [shape: f32[1,36], index: 1, kind: input, shape index: {}]   ;;  %s407_s2 = inlined_call_operand.hbm [shape: f32[1,128], index: 2, kind: output, shape index: {}]  }
   0x1   :  { %8 = vsyncpa [#allocation3], 0  ;;  %s244_s9 = smov [#allocation2]  }
   0x2   :  { %16 = dma.hbm_to_smem %s405_s0, 16, %s244_s9, [#allocation4]  }
   0x3   :  { %240 = dma.done.wait [#allocation4], 16  }
   0x4   :  { %241 = vsyncadd [#allocation4], 4294967280 }
   0x5   :  { %22 = sfence }
   0x6   :  { %s200_s12 = sld [smem:[#allocation2 + $0x1c]]  ;;  %v150_v0 = vlaneseq  ;;  %v245_v7 = vmov 0   ;;  %v182_v25 = vld [vmem:[%s406_s1] sm:$0x1]  ;;  %vm183_vm8 = vcmask 221184  }
   0x7   :  { %s265_s13 = sld [smem:[#allocation2 + $0x1d]] }
   0x8   :  { %s267_s14 = sld [smem:[#allocation2 + $0x1e]]  ;;  %v151_v1 = vand.u32 127, %v150_v0 }
   0x9   :  { %s269_s15 = sld [smem:[#allocation2 + $0x1f]] }
   0xa   :  { %s271_s16 = sld [smem:[#allocation2 + $0x20]]  ;;  %v208_v2 = vadd.s32 4294967268, %v151_v1 }
   0xb   :  { %s273_s17 = sld [smem:[#allocation2 + $0x21]] }
   0xc   :  { %s275_s0 = sld [smem:[#allocation2 + $0x22]]  ;;  %vm153_vm0 = vcmp.gt.s32.totalorder %v208_v2, 0 }
   0xd   :  { %s277_s18 = sld [smem:[#allocation2 + $0x23]]  ;;  %p31_p0 = scmp.le.f32.partialorder %s200_s12, %s265_s13  ;;  %v154_v3 = vsel %vm153_vm0, %v208_v2, 0 }
   0xe   :  { %p33_p1 = scmp.le.f32.partialorder %s200_s12, %s267_s14  ;;  %p45_p2 = scmp.le.f32.partialorder %s265_s13, %s267_s14  ;;  %v155_v4 = vshra.s32 %v154_v3, 3  ;;  %v156_v15 = vand.u32 7, %v154_v3 }
   0xf   :  { %s32_s19 = scalar_select %p31_p0, 1, 0 }
  0x10   :  { %s283_s20 = scalar_select %p33_p1, 1, 0  ;;  %v179_v21 = vcvt.s32.f32 %v156_v15 }
  0x11   :  { %p35_p3 = scmp.le.f32.partialorder %s200_s12, %s269_s15  ;;  %p37_p4 = scmp.le.f32.partialorder %s200_s12, %s271_s16 }
  0x12   :  { %p39_p5 = scmp.le.f32.partialorder %s200_s12, %s273_s17  ;;  %p41_p6 = scmp.le.f32.partialorder %s200_s12, %s275_s0 }
  0x13   :  { %s289_s21 = scalar_select %p35_p3, 1, 0 }
  0x14   :  { %s291_s22 = scalar_select %p37_p4, 1, 0 }
  0x15   :  { %s293_s23 = scalar_select %p39_p5, 1, 0 }
  0x16   :  { %s295_s24 = scalar_select %p41_p6, 1, 0 }
  0x17   :  { %p43_p7 = scmp.le.f32.partialorder %s200_s12, %s277_s18  ;;  %p50_p8 = scmp.le.f32.partialorder %s265_s13, %s269_s15 }
  0x18   :  { %s300_s25 = scalar_select %p45_p2, 1, 0 }
  0x19   :  { %s302_s26 = scalar_select %p43_p7, 1, 0 }
  0x1a   :  { %s47_s27 = sadd.s32 %s300_s25, %s283_s20  ;;  %s48_s28 = ssub.s32 1, %s300_s25 }
  0x1b   :  { %s49_s29 = sadd.s32 %s48_s28, %s32_s19  ;;  %p55_p9 = scmp.le.f32.partialorder %s265_s13, %s271_s16 }
  0x1c   :  { %s51_s30 = scalar_select %p50_p8, 1, 0 }
  0x1d   :  { %s309_s3 = scalar_select %p55_p9, 1, 0 }
  0x1e   :  { %s52_s4 = sadd.s32 %s51_s30, %s289_s21  ;;  %s53_s5 = ssub.s32 1, %s51_s30 }
  0x1f   :  { %s54_s6 = sadd.s32 %s53_s5, %s49_s29  ;;  %s57_s7 = sadd.s32 %s309_s3, %s291_s22 }
  0x20   :  { %s58_s8 = ssub.s32 1, %s309_s3  ;;  %p60_p10 = scmp.le.f32.partialorder %s265_s13, %s273_s17 }
  0x21   :  { %s59_s9 = sadd.s32 %s58_s8, %s54_s6  ;;  %p65_p11 = scmp.le.f32.partialorder %s265_s13, %s275_s0 }
  0x22   :  { %s61_s10 = scalar_select %p60_p10, 1, 0 }
  0x23   :  { %s319_s11 = scalar_select %p65_p11, 1, 0 }
  0x24   :  { %s62_s12 = sadd.s32 %s61_s10, %s293_s23  ;;  %s63_s19 = ssub.s32 1, %s61_s10 }
  0x25   :  { %s64_s21 = sadd.s32 %s63_s19, %s59_s9  ;;  %s67_s22 = sadd.s32 %s319_s11, %s295_s24 }
  0x26   :  { %s68_s28 = ssub.s32 1, %s319_s11  ;;  %p70_p12 = scmp.le.f32.partialorder %s265_s13, %s277_s18 }
  0x27   :  { %s69_s29 = sadd.s32 %s68_s28, %s64_s21  ;;  %p75_p13 = scmp.le.f32.partialorder %s267_s14, %s269_s15 }
  0x28   :  { %s71_s30 = scalar_select %p70_p12, 1, 0 }
  0x29   :  { %s76_s3 = scalar_select %p75_p13, 1, 0 }
  0x2a   :  { %s72_s5 = sadd.s32 %s71_s30, %s302_s26  ;;  %s73_s6 = ssub.s32 1, %s71_s30 }
  0x2b   :  { %s330_s23 = sadd.s32 %s73_s6, %s69_s29  ;;  %s332_s8 = sadd.s32 %s76_s3, %s52_s4 }
  0x2c   :  { %s78_s10 = ssub.s32 1, %s76_s3  ;;  %p80_p0 = scmp.le.f32.partialorder %s267_s14, %s271_s16  ;;  %v157_v5 = vstv %s330_s23 }
  0x2d   :  { %s79_s24 = sadd.s32 %s78_s10, %s47_s27  ;;  %p85_p1 = scmp.le.f32.partialorder %s267_s14, %s273_s17  ;;  %vm158_vm1 = vcmp.eq.s32.totalorder %v155_v4, %v157_v5 }
  0x2e   :  { %s81_s13 = scalar_select %p80_p0, 1, 0  ;;  %v159_v8 = vsel %vm158_vm1, 1, %v245_v7 }
  0x2f   :  { %s86_s9 = scalar_select %p85_p1, 1, 0 }
  0x30   :  { %s341_s11 = sadd.s32 %s81_s13, %s57_s7  ;;  %s83_s19 = ssub.s32 1, %s81_s13 }
  0x31   :  { %s84_s26 = sadd.s32 %s83_s19, %s79_s24  ;;  %s343_s21 = sadd.s32 %s86_s9, %s62_s12 }
  0x32   :  { %s88_s28 = ssub.s32 1, %s86_s9  ;;  %p90_p2 = scmp.le.f32.partialorder %s267_s14, %s275_s0 }
  0x33   :  { %s89_s4 = sadd.s32 %s88_s28, %s84_s26  ;;  %p95_p3 = scmp.le.f32.partialorder %s267_s14, %s277_s18 }
  0x34   :  { %s91_s20 = scalar_select %p90_p2, 1, 0 }
  0x35   :  { %s96_s25 = scalar_select %p95_p3, 1, 0 }
  0x36   :  { %s349_s27 = sadd.s32 %s91_s20, %s67_s22  ;;  %s93_s7 = ssub.s32 1, %s91_s20 }
  0x37   :  { %s94_s29 = sadd.s32 %s93_s7, %s89_s4  ;;  %s351_s12 = sadd.s32 %s96_s25, %s72_s5 }
  0x38   :  { %s98_s30 = ssub.s32 1, %s96_s25  ;;  %p100_p4 = scmp.le.f32.partialorder %s269_s15, %s271_s16 }
  0x39   :  { %s355_s14 = sadd.s32 %s98_s30, %s94_s29  ;;  %p105_p5 = scmp.le.f32.partialorder %s269_s15, %s273_s17 }
  0x3a   :  { %s359_s3 = scalar_select %p100_p4, 1, 0  ;;  %v160_v6 = vstv %s355_s14 }
  0x3b   :  { %s106_s22 = scalar_select %p105_p5, 1, 0  ;;  %vm388_vm2 = vcmp.eq.s32.totalorder %v155_v4, %v160_v6 }
  0x3c   :  { %s102_s6 = sadd.s32 %s359_s3, %s341_s11  ;;  %s103_s10 = ssub.s32 1, %s359_s3  ;;  %v162_v11 = vsel %vm388_vm2, 2, %v159_v8 }
  0x3d   :  { %s104_s5 = sadd.s32 %s103_s10, %s332_s8  ;;  %s107_s24 = sadd.s32 %s106_s22, %s343_s21 }
  0x3e   :  { %s108_s13 = ssub.s32 1, %s106_s22  ;;  %p110_p6 = scmp.le.f32.partialorder %s269_s15, %s275_s0 }
  0x3f   :  { %s109_s9 = sadd.s32 %s108_s13, %s104_s5  ;;  %p115_p7 = scmp.le.f32.partialorder %s269_s15, %s277_s18 }
  0x40   :  { %s111_s19 = scalar_select %p110_p6, 1, 0 }
  0x41   :  { %s370_s26 = scalar_select %p115_p7, 1, 0 }
  0x42   :  { %s112_s28 = sadd.s32 %s111_s19, %s349_s27  ;;  %s113_s11 = ssub.s32 1, %s111_s19 }
  0x43   :  { %s114_s4 = sadd.s32 %s113_s11, %s109_s9  ;;  %s117_s8 = sadd.s32 %s370_s26, %s351_s12 }
  0x44   :  { %s118_s21 = ssub.s32 1, %s370_s26  ;;  %p120_p8 = scmp.le.f32.partialorder %s271_s16, %s273_s17 }
  0x45   :  { %s119_s20 = sadd.s32 %s118_s21, %s114_s4  ;;  %p125_p9 = scmp.le.f32.partialorder %s271_s16, %s275_s0 }
  0x46   :  { %s121_s15 = scalar_select %p120_p8, 1, 0  ;;  %v163_v10 = vstv %s119_s20 }
  0x47   :  { %s126_s25 = scalar_select %p125_p9, 1, 0  ;;  %vm164_vm3 = vcmp.eq.s32.totalorder %v155_v4, %v163_v10 }
  0x48   :  { %s122_s7 = sadd.s32 %s121_s15, %s107_s24  ;;  %s123_s29 = ssub.s32 1, %s121_s15  ;;  %v165_v13 = vsel %vm164_vm3, 3, %v162_v11 }
  0x49   :  { %s124_s27 = sadd.s32 %s123_s29, %s102_s6  ;;  %s381_s30 = sadd.s32 %s126_s25, %s112_s28 }
  0x4a   :  { %s128_s12 = ssub.s32 1, %s126_s25  ;;  %p130_p10 = scmp.le.f32.partialorder %s271_s16, %s277_s18 }
  0x4b   :  { %s129_s3 = sadd.s32 %s128_s12, %s124_s27  ;;  %p135_p11 = scmp.le.f32.partialorder %s273_s17, %s275_s0 }
  0x4c   :  { %s131_s22 = scalar_select %p130_p10, 1, 0 }
  0x4d   :  { %s136_s23 = scalar_select %p135_p11, 1, 0 }
  0x4e   :  { %s132_s6 = sadd.s32 %s131_s22, %s117_s8  ;;  %s133_s10 = ssub.s32 1, %s131_s22 }
  0x4f   :  { %s134_s14 = sadd.s32 %s133_s10, %s129_s3  ;;  %s137_s5 = sadd.s32 %s136_s23, %s381_s30 }
  0x50   :  { %s138_s16 = ssub.s32 1, %s136_s23  ;;  %p140_p12 = scmp.le.f32.partialorder %s273_s17, %s277_s18  ;;  %v166_v12 = vstv %s134_s14 }
  0x51   :  { %s139_s24 = sadd.s32 %s138_s16, %s122_s7  ;;  %p145_p13 = scmp.le.f32.partialorder %s275_s0, %s277_s18  ;;  %vm167_vm4 = vcmp.eq.s32.totalorder %v155_v4, %v166_v12 }
  0x52   :  { %s141_s13 = scalar_select %p140_p12, 1, 0  ;;  %v168_v14 = vsel %vm167_vm4, 4, %v165_v13 }
  0x53   :  { %s146_s9 = scalar_select %p145_p13, 1, 0 }
  0x54   :  { %s142_s19 = sadd.s32 %s141_s13, %s132_s6  ;;  %s143_s26 = ssub.s32 1, %s141_s13 }
  0x55   :  { %s144_s28 = sadd.s32 %s143_s26, %s139_s24  ;;  %s147_s11 = sadd.s32 %s146_s9, %s142_s19 }
  0x56   :  { %s148_s4 = ssub.s32 1, %s146_s9  ;;  %v169_v16 = vstv %s144_s28  ;;  %v175_v17 = vstv %s147_s11  ;;  %s246_s17 = smov [#allocation5]  }
  0x57   :  { %s149_s8 = sadd.s32 %s148_s4, %s137_s5  ;;  %vm170_vm5 = vcmp.eq.s32.totalorder %v155_v4, %v169_v16  ;;  %vm176_vm6 = vcmp.eq.s32.totalorder %v155_v4, %v175_v17  ;;  %s191_s0 = sshll.u32 %s246_s17, 4  ;;  %s192_s0 = int_to_ptr.vmem [resolvable:$true] %s191_s0 }
  0x58   :  { %v171_v18 = vsel %vm170_vm5, 5, %v168_v14  ;;  %v172_v19 = vstv %s149_s8  ;;  %s220_s20 = scalar_lea.vmem %s192_s0, 16  ;;  %s224_s15 = scalar_lea.vmem %s192_s0, 32 }
  0x59   :  { %vm173_vm7 = vcmp.eq.s32.totalorder %v155_v4, %v172_v19  ;;  %p221_p0 = scmp.ne.s32.totalorder %s192_s0, %s220_s20  ;;  %p225_p1 = scmp.lt.s32.totalorder %s192_s0, %s192_s0 }
  0x5a   :  { %v174_v20 = vsel %vm173_vm7, 6, %v171_v18  ;;  %p226_p2 = scmp.lt.s32.totalorder %s224_s15, %s220_s20 }
  0x5b   :  { %v177_v22 = vsel %vm176_vm6, 7, %v174_v20 }
  0x5c   :  { %v178_v23 = vcvt.s32.f32 %v177_v22  ;;  %p227_p3 = por %p226_p2, %p225_p1 }
  0x5e   :  { %v180_v24 = vmul.f32 %v179_v21, %v178_v23  ;;  %p228_p4 = pnand %p227_p3, %p221_p0 }
  0x60   :  { %181 = vst [vmem:[#allocation5] sm:$0x1] %v180_v24 }
  0x61   :  { %184 = vst.msk [vmem:[#allocation5] sm:$0x1] %vm183_vm8, %v182_v25 }
  0x62   :  { %231 = shalt.err (!%p228_p4)
}
  0x63   :  { %194 = dma.vmem_to_hbm [thread:$0]  %s192_s0, 16, %s407_s2, [#allocation3]  }
  0x64   :  { %242 = dma.done.wait [#allocation3], 16  }
  0x65   :  { %243 = vsyncadd [#allocation3], 4294967280 }
  0x66   :  { %198 = vsyncpa [#allocation3], 1 }
  0x67   :  { %199 = vsyncpa [#allocation4], 1 }

</bundles_post_ra>
